<compile_context>
chip_gen: v7x
topology: tpu7x:2x2x1
jax: 0.10.0
libtpu: 0.0.40
codegen_flags: <defaults>
</compile_context>

<pallas_src>
import functools

import jax
import jax.numpy as jnp
from jax import lax
from jax.experimental import pallas as pl
from jax.experimental.pallas import tpu as pltpu

C_PAD = 128       # class dim padded to a full 128-lane register (lane-dense final stores)
_TM = 512         # target-row tile (tiled path)
_TK = 2048        # source-node (reduction) tile (tiled path)


def _round_up(n, m):
    return ((n + m - 1) // m) * m


def _vmem_capacity_bytes():
    """Generation-aware VMEM size (128 MiB on v5e/v6e, 64 MiB per TC on v7x)."""
    try:
        return int(pltpu.get_tpu_info().vmem_capacity_bytes)
    except Exception:
        return 64 * 1024 * 1024   # conservative fallback (v7x per-TensorCore)


def _masked_log_softmax(logits, num_classes):
    """log_softmax over the first `num_classes` lanes of a [rows, C_PAD] tile."""
    lane = lax.broadcasted_iota(jnp.int32, logits.shape, 1)
    valid = lane < num_classes
    masked = jnp.where(valid, logits, -jnp.inf)
    m = jnp.max(masked, axis=1, keepdims=True)
    s = masked - m
    lse = jnp.log(jnp.sum(jnp.where(valid, jnp.exp(s), 0.0), axis=1, keepdims=True))
    return jnp.where(valid, s - lse, 0.0)


# --------------------------------------------------------------------------------------
# Fused small-graph kernel: (A+I) resident in VMEM, all K hops + projection + log_softmax
# in a single pallas_call (A is read from HBM exactly once).
# --------------------------------------------------------------------------------------
def _fused_kernel(a_ref, s_ref, dinv_ref, w_ref, b_ref, o_ref, *, K, num_classes):
    dinv = dinv_ref[...]                       # (n_pad, 1) f32
    dinv2 = dinv * dinv
    a = a_ref[...]                             # (n_pad, n_pad) bf16, exact small integers
    s = s_ref[...]                             # (n_pad, d_pad) bf16 carry = D^{-1/2} X
    h = None
    for hop in range(K):                       # K is static -> unrolled
        acc = jnp.dot(a, s, preferred_element_type=jnp.float32)   # (A+I) @ S
        if hop + 1 < K:
            # next carry S = D^{-1} (A+I) S  (target dinv + pre-applied source dinv)
            s = (acc * dinv2).astype(jnp.bfloat16)
        else:
            h = acc * dinv                     # final H_K = D^{-1/2} (A+I) S in f32
    logits = jnp.dot(h, w_ref[...], preferred_element_type=jnp.float32) + b_ref[...]
    o_ref[...] = _masked_log_softmax(logits, num_classes)


def _fused_forward(a_pad, s0, dinv_col, w_pad, b_pad, *, K, num_classes, vmem_limit):
    n_pad, d_pad = s0.shape
    kernel = functools.partial(_fused_kernel, K=K, num_classes=num_classes)
    return pl.pallas_call(
        kernel,
        out_shape=jax.ShapeDtypeStruct((n_pad, C_PAD), jnp.float32),
        grid_spec=pltpu.PrefetchScalarGridSpec(
            num_scalar_prefetch=0,
            grid=(1,),
            in_specs=[
                pl.BlockSpec((n_pad, n_pad), lambda i: (0, 0)),   # (A+I) resident
                pl.BlockSpec((n_pad, d_pad), lambda i: (0, 0)),   # S_0 carry (bf16)
                pl.BlockSpec((n_pad, 1), lambda i: (0, 0)),       # dinv column
                pl.BlockSpec((d_pad, C_PAD), lambda i: (0, 0)),   # W
                pl.BlockSpec((1, C_PAD), lambda i: (0, 0)),       # b
            ],
            out_specs=pl.BlockSpec((n_pad, C_PAD), lambda i: (0, 0)),
        ),
        compiler_params=pltpu.CompilerParams(
            dimension_semantics=("arbitrary",),
            vmem_limit_bytes=vmem_limit,
        ),
    )(a_pad, s0, dinv_col, w_pad, b_pad)


# --------------------------------------------------------------------------------------
# Tiled path (large graphs): one pallas_call per hop.
#   Non-final hop : S_next = dinv^2 * ((A+I) @ S)          -> bf16 carry
#   Final hop     : log_softmax( (dinv * ((A+I) @ S)) @ W + b )
# Grid = (row tiles, reduction tiles); f32 accumulator scratch (tm x d_pad, ~32 KiB);
# S is VMEM-resident (constant-index full-extent spec) and sliced in-kernel.
# --------------------------------------------------------------------------------------
def _hop_kernel(a_ref, s_ref, scale_ref, o_ref, acc_ref, *, tk, s_resident):
    k = pl.program_id(1)

    @pl.when(k == 0)
    def _():
        acc_ref[...] = jnp.zeros_like(acc_ref)

    if s_resident:
        start = pl.multiple_of(k * tk, tk)
        s_blk = s_ref[pl.ds(start, tk), :]          # VMEM slice, no HBM traffic
    else:
        s_blk = s_ref[...]
    acc_ref[...] += jnp.dot(a_ref[...], s_blk, preferred_element_type=jnp.float32)

    @pl.when(k == pl.num_programs(1) - 1)
    def _():
        # scale_ref is dinv^2 for the target rows; output is the next bf16 carry.
        o_ref[...] = (acc_ref[...] * scale_ref[...]).astype(o_ref.dtype)


def _final_hop_kernel(a_ref, s_ref, dinv_ref, w_ref, b_ref, o_ref, acc_ref, *,
                      tk, s_resident, num_classes):
    k = pl.program_id(1)

    @pl.when(k == 0)
    def _():
        acc_ref[...] = jnp.zeros_like(acc_ref)

    if s_resident:
        start = pl.multiple_of(k * tk, tk)
        s_blk = s_ref[pl.ds(start, tk), :]
    else:
        s_blk = s_ref[...]
    acc_ref[...] += jnp.dot(a_ref[...], s_blk, preferred_element_type=jnp.float32)

    @pl.when(k == pl.num_programs(1) - 1)
    def _():
        h = acc_ref[...] * dinv_ref[...]            # target-row dinv (final hop only)
        logits = jnp.dot(h, w_ref[...], preferred_element_type=jnp.float32) + b_ref[...]
        o_ref[...] = _masked_log_softmax(logits, num_classes)


def _s_spec(n_pad, d_pad, tk, s_resident):
    if s_resident:
        # Constant block index -> DMA'd once per call, stays resident in VMEM.
        return pl.BlockSpec((n_pad, d_pad), lambda i, k: (0, 0))
    return pl.BlockSpec((tk, d_pad), lambda i, k: (k, 0))


def _propagate_hop(a_pad, s, dinv2_col, *, tm, tk, s_resident, vmem_limit):
    n_pad = a_pad.shape[0]
    d_pad = s.shape[1]
    kernel = functools.partial(_hop_kernel, tk=tk, s_resident=s_resident)
    return pl.pallas_call(
        kernel,
        out_shape=jax.ShapeDtypeStruct((n_pad, d_pad), jnp.bfloat16),
        grid_spec=pltpu.PrefetchScalarGridSpec(
            num_scalar_prefetch=0,
            grid=(n_pad // tm, n_pad // tk),
            in_specs=[
                pl.BlockSpec((tm, tk), lambda i, k: (i, k)),      # (A+I) tile (bf16, exact ints)
                _s_spec(n_pad, d_pad, tk, s_resident),            # bf16 carry, resident
                pl.BlockSpec((tm, 1), lambda i, k: (i, 0)),       # dinv^2: fetched once per row tile
            ],
            out_specs=pl.BlockSpec((tm, d_pad), lambda i, k: (i, 0)),
            scratch_shapes=[pltpu.VMEM((tm, d_pad), jnp.float32)],
        ),
        compiler_params=pltpu.CompilerParams(
            dimension_semantics=("parallel", "arbitrary"),
            vmem_limit_bytes=vmem_limit,
        ),
    )(a_pad, s, dinv2_col)


def _final_hop(a_pad, s, dinv_col, w_pad, b_pad, *, tm, tk, s_resident,
               num_classes, vmem_limit):
    n_pad = a_pad.shape[0]
    d_pad = s.shape[1]
    kernel = functools.partial(_final_hop_kernel, tk=tk, s_resident=s_resident,
                               num_classes=num_classes)
    return pl.pallas_call(
        kernel,
        out_shape=jax.ShapeDtypeStruct((n_pad, C_PAD), jnp.float32),
        grid_spec=pltpu.PrefetchScalarGridSpec(
            num_scalar_prefetch=0,
            grid=(n_pad // tm, n_pad // tk),
            in_specs=[
                pl.BlockSpec((tm, tk), lambda i, k: (i, k)),
                _s_spec(n_pad, d_pad, tk, s_resident),
                pl.BlockSpec((tm, 1), lambda i, k: (i, 0)),       # dinv (final hop only)
                pl.BlockSpec((d_pad, C_PAD), lambda i, k: (0, 0)),
                pl.BlockSpec((1, C_PAD), lambda i, k: (0, 0)),
            ],
            out_specs=pl.BlockSpec((tm, C_PAD), lambda i, k: (i, 0)),
            scratch_shapes=[pltpu.VMEM((tm, d_pad), jnp.float32)],
        ),
        compiler_params=pltpu.CompilerParams(
            dimension_semantics=("parallel", "arbitrary"),
            vmem_limit_bytes=vmem_limit,
        ),
    )(a_pad, s, dinv_col, w_pad, b_pad)


# --------------------------------------------------------------------------------------
# Wrapper: SGCNodeCLF.forward
# --------------------------------------------------------------------------------------
def sgc_node_clf_forward(x, edge_index, weight, bias, K: int, *, max_fused_nodes=None):
    """x: [N, D] float32, edge_index: [2, E] int32 -> [N, C] log-probs (float32)."""
    assert K >= 1, "SGC propagation requires K >= 1"
    N, D = x.shape
    C = weight.shape[1]
    assert C <= C_PAD, "num_classes > 128 needs class-dim tiling"

    cap = _vmem_capacity_bytes()
    vmem_limit = min((cap * 3) // 4, 100 * 1024 * 1024)
    d_pad = _round_up(max(D, 8), 8)

    # --- degrees / D^{-1/2} straight from the edge list (no f32 N^2 pass) ---
    src = edge_index[0].astype(jnp.int32)
    dst = edge_index[1].astype(jnp.int32)
    deg = jnp.zeros((N,), jnp.float32).at[dst].add(1.0)
    has_self = jnp.zeros((N,), jnp.float32).at[dst].add((src == dst).astype(jnp.float32))
    missing = (has_self == 0.0).astype(jnp.float32)     # add_remaining_self_loops
    deg = deg + missing
    dinv = jnp.where(deg > 0.0, lax.rsqrt(deg), 0.0)

    # --- path selection: fused (A resident in VMEM) vs tiled multi-call ---
    n_fused = _round_up(max(N, 128), 128)
    fused_bytes = (2 * n_fused * n_fused * 2                       # bf16 A (double-buffer margin)
                   + n_fused * (d_pad * 2 + C_PAD * 4 + 128 * 4 + d_pad * 8))
    if max_fused_nodes is not None:
        use_fused = N <= max_fused_nodes
    else:
        use_fused = fused_bytes <= (cap * 9) // 20                 # ~0.45 * physical VMEM

    if use_fused:
        n_pad, tm, tk = n_fused, n_fused, n_fused
    else:
        tm, tk = _TM, _TK
        n_pad = _round_up(N, tk)                                   # >= 4 row tiles (v7x megacore)

    # --- build (A + I_missing) directly into the padded bf16 buffer (exact small ints) ---
    ones = jnp.ones_like(src, dtype=jnp.bfloat16)
    a_pad = jnp.zeros((n_pad, n_pad), jnp.bfloat16).at[dst, src].add(ones)
    idx = jnp.arange(N, dtype=jnp.int32)
    a_pad = a_pad.at[idx, idx].add(missing.astype(jnp.bfloat16))

    dinv_col = jnp.pad(dinv, (0, n_pad - N)).reshape(n_pad, 1)
    x_pad = jnp.pad(x.astype(jnp.float32), ((0, n_pad - N), (0, d_pad - D)))
    s0 = (x_pad * dinv_col).astype(jnp.bfloat16)        # pre-scaled carry S_0 = D^{-1/2} X
    w_pad = jnp.pad(weight.astype(jnp.float32), ((0, d_pad - D), (0, C_PAD - C)))
    b_pad = jnp.pad(bias.astype(jnp.float32), (0, C_PAD - C)).reshape(1, C_PAD)

    if use_fused:
        out = _fused_forward(a_pad, s0, dinv_col, w_pad, b_pad,
                             K=K, num_classes=C, vmem_limit=vmem_limit)
    else:
        s_resident = (2 * n_pad * d_pad * 2) <= cap // 8
        dinv2_col = dinv_col * dinv_col
        s = s0
        for _ in range(K - 1):
            s = _propagate_hop(a_pad, s, dinv2_col, tm=tm, tk=tk,
                               s_resident=s_resident, vmem_limit=vmem_limit)
        out = _final_hop(a_pad, s, dinv_col, w_pad, b_pad, tm=tm, tk=tk,
                         s_resident=s_resident, num_classes=C, vmem_limit=vmem_limit)

    return out[:N, :C]


# --------------------------------------------------------------------------------------
# Reference (plain JAX, f32) for numerical sanity.
# --------------------------------------------------------------------------------------
def _reference(x, edge_index, weight, bias, K):
    N = x.shape[0]
    src, dst = edge_index[0], edge_index[1]
    A = jnp.zeros((N, N), jnp.float32).at[dst, src].add(1.0)
    diag = jnp.diagonal(A)
    A = A + jnp.diag(jnp.where(diag > 0.0, 0.0, 1.0))
    deg = jnp.sum(A, axis=1)
    dinv = jnp.where(deg > 0.0, lax.rsqrt(deg), 0.0)
    a_hat = dinv[:, None] * A * dinv[None, :]
    h = x
    for _ in range(K):
        h = a_hat @ h
    return jax.nn.log_softmax(h @ weight + bias, axis=1)


if __name__ == "__main__":
    key = jax.random.PRNGKey(0)
    kx, ke1, ke2, kw, kb, kx2, ke3, ke4 = jax.random.split(key, 8)

    # ---- Test 1: small graph -> fused A-resident path (all K hops in one pallas_call) ----
    N, IN_DIM, NUM_CLASSES, K, E = 32, 16, 8, 2, 96
    x = jax.random.normal(kx, (N, IN_DIM), dtype=jnp.float32)
    src = jax.random.randint(ke1, (E,), 0, N, dtype=jnp.int32)
    dst = jax.random.randint(ke2, (E,), 0, N, dtype=jnp.int32)
    edge_index = jnp.stack([src, dst], axis=0)                       # [2, E]
    limit = (6.0 / (IN_DIM + NUM_CLASSES)) ** 0.5
    weight = jax.random.uniform(kw, (IN_DIM, NUM_CLASSES), jnp.float32, -limit, limit)
    bias = jax.random.uniform(kb, (NUM_CLASSES,), jnp.float32, -0.1, 0.1)

    out = jax.block_until_ready(sgc_node_clf_forward(x, edge_index, weight, bias, K))
    ref = _reference(x, edge_index, weight, bias, K)
    assert out.shape == (N, NUM_CLASSES)
    assert bool(jnp.all(jnp.abs(jnp.sum(jnp.exp(out), axis=1) - 1.0) < 1e-4))
    assert bool(jnp.max(jnp.abs(out - ref)) < 5e-2), float(jnp.max(jnp.abs(out - ref)))

    # ---- Test 2: larger graph, tiled multi-call path forced (max_fused_nodes=0) ----
    N2, E2, K2 = 2500, 8000, 2
    x2 = jax.random.normal(kx2, (N2, IN_DIM), dtype=jnp.float32)
    src2 = jax.random.randint(ke3, (E2,), 0, N2, dtype=jnp.int32)
    dst2 = jax.random.randint(ke4, (E2,), 0, N2, dtype=jnp.int32)
    edge_index2 = jnp.stack([src2, dst2], axis=0)

    out2 = jax.block_until_ready(
        sgc_node_clf_forward(x2, edge_index2, weight, bias, K2, max_fused_nodes=0))
    ref2 = _reference(x2, edge_index2, weight, bias, K2)
    assert out2.shape == (N2, NUM_CLASSES)
    assert bool(jnp.all(jnp.abs(jnp.sum(jnp.exp(out2), axis=1) - 1.0) < 1e-4))
    assert bool(jnp.max(jnp.abs(out2 - ref2)) < 1e-1), float(jnp.max(jnp.abs(out2 - ref2)))

    print("KERNEL_OK")
</pallas_src>

<mosaic_0001>
module attributes {stable_mosaic.version = 11 : i64} {
  func.func @_fused_kernel(%arg0: i32, %arg1: memref<128x128xbf16, #tpu.memory_space<vmem>>, %arg2: memref<128x16xbf16, #tpu.memory_space<vmem>>, %arg3: memref<128x1xf32, #tpu.memory_space<vmem>>, %arg4: memref<16x128xf32, #tpu.memory_space<vmem>>, %arg5: memref<1x128xf32, #tpu.memory_space<vmem>>, %arg6: memref<128x128xf32, #tpu.memory_space<vmem>>) attributes {dimension_semantics = [#tpu.dimension_semantics<arbitrary>], iteration_bounds = array<i64: 1>, scalar_prefetch = 0 : i64, scratch_operands = 0 : i64, tpu.core_type = #tpu.core_type<tc>, window_params = [{pipeline_mode = #tpu.pipeline_mode<synchronous>, transform_indices = @transform_0, window_bounds = array<i64: 128, 128>}, {pipeline_mode = #tpu.pipeline_mode<synchronous>, transform_indices = @transform_1, window_bounds = array<i64: 128, 16>}, {pipeline_mode = #tpu.pipeline_mode<synchronous>, transform_indices = @transform_2, window_bounds = array<i64: 128, 1>}, {pipeline_mode = #tpu.pipeline_mode<synchronous>, transform_indices = @transform_3, window_bounds = array<i64: 16, 128>}, {pipeline_mode = #tpu.pipeline_mode<synchronous>, transform_indices = @transform_4, window_bounds = array<i64: 1, 128>}, {pipeline_mode = #tpu.pipeline_mode<synchronous>, transform_indices = @transform_5, window_bounds = array<i64: 128, 128>}]} {
    %c0 = arith.constant 0 : index
    %c0_0 = arith.constant 0 : index
    %0 = vector.load %arg3[%c0, %c0_0] : memref<128x1xf32, #tpu.memory_space<vmem>>, vector<128x1xf32>
    %1 = arith.mulf %0, %0 : vector<128x1xf32>
    %c0_1 = arith.constant 0 : index
    %c0_2 = arith.constant 0 : index
    %2 = vector.load %arg1[%c0_1, %c0_2] : memref<128x128xbf16, #tpu.memory_space<vmem>>, vector<128x128xbf16>
    %c0_3 = arith.constant 0 : index
    %c0_4 = arith.constant 0 : index
    %3 = vector.load %arg2[%c0_3, %c0_4] : memref<128x16xbf16, #tpu.memory_space<vmem>>, vector<128x16xbf16>
    %cst = arith.constant dense<0.000000e+00> : vector<128x16xf32>
    %4 = tpu.matmul %2, %3, %cst {dimension_numbers = #tpu.dot_dimension_numbers<[1], [0], [0], [1], [0, 0, 1, 1], [], []>} : vector<128x128xbf16>, vector<128x16xbf16>, vector<128x16xf32> -> vector<128x16xf32>
    %5 = vector.broadcast %1 : vector<128x1xf32> to vector<128x16xf32>
    %6 = arith.mulf %4, %5 : vector<128x16xf32>
    %7 = arith.truncf %6 : vector<128x16xf32> to vector<128x16xbf16>
    %cst_5 = arith.constant dense<0.000000e+00> : vector<128x16xf32>
    %8 = tpu.matmul %2, %7, %cst_5 {dimension_numbers = #tpu.dot_dimension_numbers<[1], [0], [0], [1], [0, 0, 1, 1], [], []>} : vector<128x128xbf16>, vector<128x16xbf16>, vector<128x16xf32> -> vector<128x16xf32>
    %9 = vector.broadcast %0 : vector<128x1xf32> to vector<128x16xf32>
    %10 = arith.mulf %8, %9 : vector<128x16xf32>
    %c0_6 = arith.constant 0 : index
    %c0_7 = arith.constant 0 : index
    %11 = vector.load %arg4[%c0_6, %c0_7] : memref<16x128xf32, #tpu.memory_space<vmem>>, vector<16x128xf32>
    %cst_8 = arith.constant dense<0.000000e+00> : vector<128x128xf32>
    %12 = tpu.matmul %10, %11, %cst_8 {dimension_numbers = #tpu.dot_dimension_numbers<[1], [0], [0], [1], [0, 0, 1, 1], [], []>} : vector<128x16xf32>, vector<16x128xf32>, vector<128x128xf32> -> vector<128x128xf32>
    %c0_9 = arith.constant 0 : index
    %c0_10 = arith.constant 0 : index
    %13 = vector.load %arg5[%c0_9, %c0_10] : memref<1x128xf32, #tpu.memory_space<vmem>>, vector<1x128xf32>
    %14 = vector.broadcast %13 : vector<1x128xf32> to vector<128x128xf32>
    %15 = arith.addf %12, %14 : vector<128x128xf32>
    %16 = tpu.iota {dimensions = array<i32: 1>} : vector<128x128xi32>
    %c8_i32 = arith.constant 8 : i32
    %17 = vector.broadcast %c8_i32 : i32 to vector<128x128xi32>
    %18 = arith.cmpi slt, %16, %17 : vector<128x128xi32>
    %cst_11 = arith.constant 0xFF800000 : f32
    %19 = vector.broadcast %cst_11 : f32 to vector<128x128xf32>
    %20 = arith.select %18, %15, %19 : vector<128x128xi1>, vector<128x128xf32>
    %cst_12 = arith.constant dense<0xFF800000> : vector<128xf32>
    %21 = vector.multi_reduction <maximumf>, %20, %cst_12 [1] : vector<128x128xf32> to vector<128xf32>
    %22 = vector.shape_cast %21 : vector<128xf32> to vector<128x1xf32>
    %23 = vector.broadcast %22 : vector<128x1xf32> to vector<128x128xf32>
    %24 = arith.subf %20, %23 : vector<128x128xf32>
    %25 = math.exp %24 : vector<128x128xf32>
    %cst_13 = arith.constant 0.000000e+00 : f32
    %26 = vector.broadcast %cst_13 : f32 to vector<128x128xf32>
    %27 = arith.select %18, %25, %26 : vector<128x128xi1>, vector<128x128xf32>
    %cst_14 = arith.constant dense<0.000000e+00> : vector<128xf32>
    %28 = vector.multi_reduction <add>, %27, %cst_14 [1] : vector<128x128xf32> to vector<128xf32>
    %29 = vector.shape_cast %28 : vector<128xf32> to vector<128x1xf32>
    %30 = math.log %29 : vector<128x1xf32>
    %31 = vector.broadcast %30 : vector<128x1xf32> to vector<128x128xf32>
    %32 = arith.subf %24, %31 : vector<128x128xf32>
    %cst_15 = arith.constant 0.000000e+00 : f32
    %33 = vector.broadcast %cst_15 : f32 to vector<128x128xf32>
    %34 = arith.select %18, %32, %33 : vector<128x128xi1>, vector<128x128xf32>
    %c0_16 = arith.constant 0 : index
    %c0_17 = arith.constant 0 : index
    %35 = vector.load %arg6[%c0_16, %c0_17] : memref<128x128xf32, #tpu.memory_space<vmem>>, vector<128x128xf32>
    tpu.vector_store %arg6[%c0_16, %c0_17], %34 {strides = array<i32>} : memref<128x128xf32, #tpu.memory_space<vmem>>, vector<128x128xf32>,
    return
  }
  func.func @transform_0(%arg0: i32) -> (i32, i32) {
    %c0_i32 = arith.constant 0 : i32
    %c0_i32_0 = arith.constant 0 : i32
    %c0_i32_1 = arith.constant 0 : i32
    return %c0_i32, %c0_i32_0 : i32, i32
  }
  func.func @transform_1(%arg0: i32) -> (i32, i32) {
    %c0_i32 = arith.constant 0 : i32
    %c0_i32_0 = arith.constant 0 : i32
    %c0_i32_1 = arith.constant 0 : i32
    return %c0_i32, %c0_i32_0 : i32, i32
  }
  func.func @transform_2(%arg0: i32) -> (i32, i32) {
    %c0_i32 = arith.constant 0 : i32
    %c0_i32_0 = arith.constant 0 : i32
    %c0_i32_1 = arith.constant 0 : i32
    return %c0_i32, %c0_i32_0 : i32, i32
  }
  func.func @transform_3(%arg0: i32) -> (i32, i32) {
    %c0_i32 = arith.constant 0 : i32
    %c0_i32_0 = arith.constant 0 : i32
    %c0_i32_1 = arith.constant 0 : i32
    return %c0_i32, %c0_i32_0 : i32, i32
  }
  func.func @transform_4(%arg0: i32) -> (i32, i32) {
    %c0_i32 = arith.constant 0 : i32
    %c0_i32_0 = arith.constant 0 : i32
    %c0_i32_1 = arith.constant 0 : i32
    return %c0_i32, %c0_i32_0 : i32, i32
  }
  func.func @transform_5(%arg0: i32) -> (i32, i32) {
    %c0_i32 = arith.constant 0 : i32
    %c0_i32_0 = arith.constant 0 : i32
    %c0_i32_1 = arith.constant 0 : i32
    return %c0_i32, %c0_i32_0 : i32, i32
  }
}

</mosaic_0001>

<bundles_post_ra>
// kernel: tpu_custom_call.1
= control target key start
LH: loop header
LB: loop body
LE: loop exit
PB: predicated region body
PF: predicated region fallthrough
CT: control target
= control target key end

     0   :  { %v1313_v2 = vmov 0   ;;  %s1739_s0 = inlined_call_operand.vmem [shape: bf16[128,128], index: 0, kind: input, shape index: {}]   ;;  %s1740_s1 = inlined_call_operand.vmem [shape: bf16[128,16], index: 1, kind: input, shape index: {}]   ;;  %s1741_s2 = inlined_call_operand.vmem [shape: f32[128,1], index: 2, kind: input, shape index: {}]   ;;  %s1742_s3 = inlined_call_operand.vmem [shape: f32[16,128], index: 3, kind: input, shape index: {}]   ;;  %s1743_s4 = inlined_call_operand.vmem [shape: f32[1,128], index: 4, kind: input, shape index: {}]   ;;  %s1744_s5 = inlined_call_operand.hbm [shape: f32[128,128], index: 5, kind: output, shape index: {}]  }
   0x1   :  { %v1209_v0 = vld [vmem:[%s1740_s1] sm:$0xff]   ;;  %v1210_v1 = vld [vmem:[%s1740_s1 + $0x8] sm:$0xff]   ;;  %1207 = vset.pattern.permute.xlu0 %v1313_v2  ;;  %1208 = vset.pattern.permute.xlu1 %v1313_v2  ;;  %v1211_v3 = vld [vmem:[%s1740_s1 + $0x10] sm:$0xff]  }
   0x2   :  { %1105 = vmatprep.subr.bf16.mxu0 %v1209_v0  ;;  %v1212_v4 = vld [vmem:[%s1740_s1 + $0x18] sm:$0xff]   ;;  %v1217_v5 = vld [vmem:[%s1739_s0] sm:$0xff]   ;;  %v1214_v8 = vld [vmem:[%s1740_s1 + $0x28] sm:$0xff]  }
   0x3   :  { %1106 = vmatpush3.bf16.msra.mxu0 %v1209_v0  ;;  %1121 = vmatprep.mubr.bf16.mxu0 %v1217_v5  ;;  %v1213_v6 = vld [vmem:[%s1740_s1 + $0x20] sm:$0xff]   ;;  %v1378_v10 = vld [vmem:[%s1741_s2 + $0x10] sm:$0xff]  ;;  %v1383_v11 = vld [vmem:[%s1741_s2 + $0x8] sm:$0xff] }
   0x4   :  { %1107 = vmatprep.subr.bf16.mxu0 %v1210_v1  ;;  %1153 = vmatprep.mubr.bf16.mxu1 %v1217_v5  ;;  %v1368_v7 = vld [vmem:[%s1741_s2] sm:$0xff]  ;;  %v40_v12 = vmul.f32 %v1378_v10, %v1378_v10  ;;  %v1390_v13 = vld [vmem:[%s1741_s2 + $0x18] sm:$0xff]  ;;  %v39_v14 = vmul.f32 %v1383_v11, %v1383_v11  ;;  %v1215_v17 = vld [vmem:[%s1740_s1 + $0x30] sm:$0xff]  }
   0x5   :  { %v38_v9 = vmul.f32 %v1368_v7, %v1368_v7  ;;  %v41_v15 = vmul.f32 %v1390_v13, %v1390_v13  ;;  %v1399_v16 = vld [vmem:[%s1741_s2 + $0x20] sm:$0xff]  ;;  %v1407_v18 = vld [vmem:[%s1741_s2 + $0x28] sm:$0xff] }
   0x6   :  { %291 = vperm.xlu1 %1208, %v40_v12  }
   0x7   :  { %1108 = vmatpush3.bf16.msra.mxu0 %v1210_v1  ;;  %281 = vperm.xlu0 %1207, %v38_v9  }
   0x8   :  { %1109 = vmatprep.subr.bf16.mxu0 %v1211_v3 }
   0xb   :  { %1110 = vmatpush3.bf16.msra.mxu0 %v1211_v3 }
   0xc   :  { %1111 = vmatprep.subr.bf16.mxu0 %v1212_v4 }
   0xf   :  { %1112 = vmatpush3.bf16.msra.mxu0 %v1212_v4 }
  0x10   :  { %1113 = vmatprep.subr.bf16.mxu0 %v1213_v6 }
  0x13   :  { %1114 = vmatpush3.bf16.msra.mxu0 %v1213_v6 }
  0x14   :  { %1115 = vmatprep.subr.bf16.mxu0 %v1214_v8 }
  0x15   :  { %10 = vsyncpa [#allocation3], 0  ;;  %286 = vperm.xlu0 %1207, %v39_v14   ;;  %v42_v19 = vmul.f32 %v1399_v16, %v1399_v16  ;;  %296 = vperm.xlu1 %1208, %v41_v15   ;;  %v43_v20 = vmul.f32 %v1407_v18, %v1407_v18  ;;  %v28_v21 = vld [vmem:[%s1741_s2 + $0x30] sm:$0xff]  ;;  %v1216_v22 = vld [vmem:[%s1740_s1 + $0x38] sm:$0xff]   ;;  %vm585_vm0 = vcmask 130048  }
  0x16   :  { %v29_v23 = vld [vmem:[%s1741_s2 + $0x38] sm:$0xff]  ;;  %v44_v24 = vmul.f32 %v28_v21, %v28_v21  ;;  %v30_v26 = vld [vmem:[%s1741_s2 + $0x40] sm:$0xff]  ;;  %v31_v27 = vld [vmem:[%s1741_s2 + $0x48] sm:$0xff] }
  0x17   :  { %1116 = vmatpush3.bf16.msra.mxu0 %v1214_v8  ;;  %v45_v25 = vmul.f32 %v29_v23, %v29_v23  ;;  %v1431_v28 = vld [vmem:[%s1739_s0 + $0x8] sm:$0xff]   ;;  %v46_v29 = vmul.f32 %v30_v26, %v30_v26  ;;  %v1436_v30 = vld [vmem:[%s1739_s0 + $0x10] sm:$0xff]   ;;  %v47_v31 = vmul.f32 %v31_v27, %v31_v27  ;;  %v33_v33 = vld [vmem:[%s1741_s2 + $0x58] sm:$0xff] }
  0x18   :  { %1117 = vmatprep.subr.bf16.mxu0 %v1215_v17  ;;  %v32_v32 = vld [vmem:[%s1741_s2 + $0x50] sm:$0xff]  ;;  %v49_v35 = vmul.f32 %v33_v33, %v33_v33  ;;  %v34_v36 = vld [vmem:[%s1741_s2 + $0x60] sm:$0xff]  ;;  %v35_v37 = vld [vmem:[%s1741_s2 + $0x68] sm:$0xff] }
  0x19   :  { %301 = vperm.xlu0 %1207, %v42_v19   ;;  %306 = vperm.xlu1 %1208, %v43_v20   ;;  %v48_v34 = vmul.f32 %v32_v32, %v32_v32  ;;  %v1455_v38 = vld [vmem:[%s1739_s0 + $0x18] sm:$0xff]   ;;  %v50_v39 = vmul.f32 %v34_v36, %v34_v36  ;;  %v1460_v40 = vld [vmem:[%s1739_s0 + $0x20] sm:$0xff]   ;;  %v51_v41 = vmul.f32 %v35_v37, %v35_v37  ;;  %v36_v42 = vld [vmem:[%s1741_s2 + $0x70] sm:$0xff] }
  0x1a   :  { %v37_v43 = vld [vmem:[%s1741_s2 + $0x78] sm:$0xff]  ;;  %v52_v44 = vmul.f32 %v36_v42, %v36_v42  ;;  %v1473_v46 = vld [vmem:[%s1739_s0 + $0x28] sm:$0xff]   ;;  %v1478_v47 = vld [vmem:[%s1739_s0 + $0x30] sm:$0xff]  }
  0x1b   :  { %1118 = vmatpush3.bf16.msra.mxu0 %v1215_v17  ;;  %v53_v45 = vmul.f32 %v37_v43, %v37_v43  ;;  %v1486_v48 = vld [vmem:[%s1739_s0 + $0x38] sm:$0xff]   ;;  %v576_v49 = vld [vmem:[%s1742_s3] sm:$0xff]  ;;  %v577_v50 = vld [vmem:[%s1742_s3 + $0x8] sm:$0xff] }
  0x1c   :  { %1119 = vmatprep.subr.bf16.mxu0 %v1216_v22  ;;  %v1500_v51 = vpack.c.bf16 %v577_v50, %v576_v49 }
  0x1d   :  { %311 = vperm.xlu0 %1207, %v44_v24   ;;  %316 = vperm.xlu1 %1208, %v45_v25  }
  0x1f   :  { %1120 = vmatpush3.bf16.msra.mxu0 %v1216_v22 }
  0x20   :  { %1198 = vmatprep.subr.bf16.mxu0 %v1500_v51 }
  0x21   :  { %321 = vperm.xlu0 %1207, %v46_v29   ;;  %326 = vperm.xlu1 %1208, %v47_v31  }
  0x22   :  { %1122 = vmatmul.mubr.bf16.vlgmr.msra.gmra.mrb[0].mxu0 %v1431_v28 }
  0x23   :  { %1125 = vmatprep.mubr.bf16.mxu0 %v1436_v30  ;;  %1200 = vmatpush3.bf16.msra.mxu0 %v1500_v51 }
  0x25   :  { %331 = vperm.xlu0 %1207, %v48_v34   ;;  %336 = vperm.xlu1 %1208, %v49_v35  }
  0x29   :  { %341 = vperm.xlu0 %1207, %v50_v39   ;;  %346 = vperm.xlu1 %1208, %v51_v41  }
  0x2a   :  { %1126 = vmatmul.mubr.bf16.gmra.mrb[4].mxu0 %v1455_v38 }
  0x2b   :  { %1129 = vmatprep.mubr.bf16.mxu0 %v1460_v40 }
  0x2d   :  { %351 = vperm.xlu0 %1207, %v52_v44   ;;  %356 = vperm.xlu1 %1208, %v53_v45  }
  0x31   :  { %482 = vperm.xlu0 %1207, %v1368_v7   ;;  %522 = vperm.xlu1 %1208, %v30_v26  }
  0x32   :  { %1130 = vmatmul.mubr.bf16.gmra.mrb[8].mxu0 %v1473_v46 }
  0x33   :  { %1133 = vmatprep.mubr.bf16.mxu0 %v1478_v47 }
  0x35   :  { %487 = vperm.xlu0 %1207, %v1383_v11   ;;  %527 = vperm.xlu1 %1208, %v31_v27  }
  0x39   :  { %492 = vperm.xlu0 %1207, %v1378_v10   ;;  %532 = vperm.xlu1 %1208, %v32_v32  }
  0x3a   :  { %1134 = vmatmul.mubr.bf16.gmra.mrb[12].mxu0 %v1486_v48 }
  0x3d   :  { %497 = vperm.xlu0 %1207, %v1390_v13   ;;  %537 = vperm.xlu1 %1208, %v33_v33  }
  0x41   :  { %502 = vperm.xlu0 %1207, %v1399_v16   ;;  %542 = vperm.xlu1 %1208, %v34_v36  }
  0x45   :  { %507 = vperm.xlu0 %1207, %v1407_v18   ;;  %547 = vperm.xlu1 %1208, %v35_v37  }
  0x49   :  { %512 = vperm.xlu0 %1207, %v28_v21   ;;  %552 = vperm.xlu1 %1208, %v36_v42  }
  0x4d   :  { %517 = vperm.xlu0 %1207, %v29_v23   ;;  %557 = vperm.xlu1 %1208, %v37_v43  }
  0x85   :  { %v292_v53 = vpop.permute.xlu1 %291 }
  0x86   :  { %v282_v52 = vpop.permute.xlu0 %281 }
  0x94   :  { %v287_v54 = vpop.permute.xlu0 %286  ;;  %v297_v55 = vpop.permute.xlu1 %296 }
  0x98   :  { %v302_v56 = vpop.permute.xlu0 %301  ;;  %v307_v57 = vpop.permute.xlu1 %306 }
  0x9c   :  { %v312_v59 = vpop.permute.xlu0 %311  ;;  %v317_v61 = vpop.permute.xlu1 %316 }
  0xa0   :  { %v322_v6 = vpop.permute.xlu0 %321  ;;  %v327_v7 = vpop.permute.xlu1 %326 }
  0xa4   :  { %v332_v16 = vpop.permute.xlu0 %331  ;;  %v337_v18 = vpop.permute.xlu1 %336 }
  0xa8   :  { %v342_v23 = vpop.permute.xlu0 %341  ;;  %v347_v27 = vpop.permute.xlu1 %346 }
  0xac   :  { %v352_v35 = vpop.permute.xlu0 %351  ;;  %v357_v37 = vpop.permute.xlu1 %356 }
  0xf5   :  { %v1123_v58 = vpop.f32.mrb[0].mxu0 }
  0xf6   :  { %v216_v60 = vpop.f32.mrb[1].mxu0  ;;  %v361_v63 = vmul.f32 %v1123_v58, %v292_v53 }
  0xf7   :  { %v1124_v62 = vpop.f32.mrb[2].mxu0  ;;  %v359_v2 = vmul.f32 %v282_v52, %v216_v60  ;;  %v483_v52 = vpop.permute.xlu0 %482 }
  0xf8   :  { %v362_v0 = vmul.f32 %v1124_v62, %v297_v55  ;;  %v219_v1 = vpop.f32.mrb[3].mxu0  ;;  %v523_v55 = vpop.permute.xlu1 %522 }
  0xf9   :  { %v360_v3 = vmul.f32 %v287_v54, %v219_v1 }
  0xfa   :  { %v376_v4 = vpack.c.bf16 %v362_v0, %v361_v63 }
  0xfb   :  { %v375_v5 = vpack.c.bf16 %v360_v3, %v359_v2  ;;  %v488_v53 = vpop.permute.xlu0 %487 }
  0xfd   :  { %v1127_v8 = vpop.f32.mrb[4].mxu0  ;;  %1137 = vmatprep.subr.bf16.mxu1 %v375_v5 }
  0xfe   :  { %v232_v9 = vpop.f32.mrb[5].mxu0  ;;  %1138 = vmatpush3.bf16.msra.mxu1 %v375_v5  ;;  %v365_v11 = vmul.f32 %v1127_v8, %v312_v59 }
  0xff   :  { %v1128_v10 = vpop.f32.mrb[6].mxu0  ;;  %1139 = vmatprep.subr.bf16.mxu1 %v376_v4  ;;  %v363_v14 = vmul.f32 %v302_v56, %v232_v9  ;;  %v493_v54 = vpop.permute.xlu0 %492 }
 0x100   :  { %v366_v12 = vmul.f32 %v1128_v10, %v317_v61  ;;  %v235_v13 = vpop.f32.mrb[7].mxu0 }
 0x101   :  { %v364_v15 = vmul.f32 %v307_v57, %v235_v13 }
 0x102   :  { %v378_v17 = vpack.c.bf16 %v366_v12, %v365_v11  ;;  %1140 = vmatpush3.bf16.msra.mxu1 %v376_v4 }
 0x103   :  { %v377_v19 = vpack.c.bf16 %v364_v15, %v363_v14  ;;  %v498_v56 = vpop.permute.xlu0 %497 }
 0x105   :  { %v1131_v20 = vpop.f32.mrb[8].mxu0  ;;  %1141 = vmatprep.subr.bf16.mxu1 %v377_v19 }
 0x106   :  { %v248_v21 = vpop.f32.mrb[9].mxu0  ;;  %1142 = vmatpush3.bf16.msra.mxu1 %v377_v19  ;;  %v369_v24 = vmul.f32 %v1131_v20, %v332_v16 }
 0x107   :  { %v1132_v22 = vpop.f32.mrb[10].mxu0  ;;  %1143 = vmatprep.subr.bf16.mxu1 %v378_v17  ;;  %v367_v29 = vmul.f32 %v322_v6, %v248_v21  ;;  %v503_v57 = vpop.permute.xlu0 %502 }
 0x108   :  { %v370_v25 = vmul.f32 %v1132_v22, %v337_v18  ;;  %v251_v26 = vpop.f32.mrb[11].mxu0 }
 0x109   :  { %v368_v31 = vmul.f32 %v327_v7, %v251_v26 }
 0x10a   :  { %v380_v32 = vpack.c.bf16 %v370_v25, %v369_v24  ;;  %1144 = vmatpush3.bf16.msra.mxu1 %v378_v17 }
 0x10b   :  { %v379_v33 = vpack.c.bf16 %v368_v31, %v367_v29  ;;  %v779_v29 = vlaneseq }
 0x10d   :  { %v1135_v34 = vpop.f32.mrb[12].mxu0  ;;  %1145 = vmatprep.subr.bf16.mxu1 %v379_v33  ;;  %v1529_v31 = vand.u32 127, %v779_v29 }
 0x10e   :  { %v264_v36 = vpop.f32.mrb[13].mxu0  ;;  %1146 = vmatpush3.bf16.msra.mxu1 %v379_v33  ;;  %v373_v41 = vmul.f32 %v1135_v34, %v352_v35 }
 0x10f   :  { %v1136_v39 = vpop.f32.mrb[14].mxu0  ;;  %1147 = vmatprep.subr.bf16.mxu1 %v380_v32  ;;  %v371_v44 = vmul.f32 %v342_v23, %v264_v36  ;;  %vm781_vm1 = vcmp.lt.s32.totalorder %v1529_v31, 8 }
 0x110   :  { %v374_v42 = vmul.f32 %v1136_v39, %v357_v37  ;;  %v267_v43 = vpop.f32.mrb[15].mxu0 }
 0x111   :  { %v372_v45 = vmul.f32 %v347_v27, %v267_v43 }
 0x112   :  { %v382_v49 = vpack.c.bf16 %v374_v42, %v373_v41  ;;  %1148 = vmatpush3.bf16.msra.mxu1 %v380_v32  ;;  %v1038_v32 = vld [vmem:[%s1743_s4] ss:$0 sm:$0xff]  ;;  %s1314_s4 = smov [#allocation2]  }
 0x113   :  { %v381_v50 = vpack.c.bf16 %v372_v45, %v371_v44  ;;  %s1011_s8 = sshll.u32 %s1314_s4, 4  ;;  %s1012_s8 = int_to_ptr.vmem [resolvable:$true] %s1011_s8 }
 0x114   :  { %s1289_s9 = scalar_lea.vmem %s1012_s8, 2048  ;;  %p1294_p1 = scmp.lt.s32.totalorder %s1012_s8, %s1012_s8 }
 0x115   :  { %1149 = vmatprep.subr.bf16.mxu1 %v381_v50  ;;  %p1290_p0 = scmp.ne.s32.totalorder %s1012_s8, %s1289_s9  ;;  %p1295_p2 = scmp.lt.s32.totalorder %s1289_s9, %s1289_s9 }
 0x116   :  { %1150 = vmatpush3.bf16.msra.mxu1 %v381_v50 }
 0x117   :  { %1151 = vmatprep.subr.bf16.mxu1 %v382_v49  ;;  %p1296_p3 = por %p1295_p2, %p1294_p1 }
 0x119   :  { %p1297_p4 = pnand %p1296_p3, %p1290_p0 }
 0x11a   :  { %1152 = vmatpush3.bf16.msra.mxu1 %v382_v49 }
 0x11b   :  { %1201 = vmatprep.subr.bf16.mxu1 %v1500_v51 }
 0x11d   :  { %1154 = vmatmul.mubr.bf16.vlgmr.msra.gmra.mrb[0].mxu1 %v1431_v28  ;;  %v528_v28 = vpop.permute.xlu1 %527 }
 0x11e   :  { %1157 = vmatprep.mubr.bf16.mxu1 %v1436_v30  ;;  %1202 = vmatpush3.bf16.msra.mxu1 %v1500_v51 }
 0x121   :  { %v533_v58 = vpop.permute.xlu1 %532 }
 0x125   :  { %1158 = vmatmul.mubr.bf16.gmra.mrb[4].mxu1 %v1455_v38 }
 0x126   :  { %1161 = vmatprep.mubr.bf16.mxu1 %v1460_v40  ;;  %v508_v40 = vpop.permute.xlu0 %507 }
 0x12a   :  { %v513_v63 = vpop.permute.xlu0 %512 }
 0x12d   :  { %1162 = vmatmul.mubr.bf16.gmra.mrb[8].mxu1 %v1473_v46 }
 0x12e   :  { %1165 = vmatprep.mubr.bf16.mxu1 %v1478_v47  ;;  %v518_v7 = vpop.permute.xlu0 %517 }
 0x135   :  { %1166 = vmatmul.mubr.bf16.gmra.mrb[12].mxu1 %v1486_v48  ;;  %v538_v48 = vpop.permute.xlu1 %537 }
 0x139   :  { %v543_v5 = vpop.permute.xlu1 %542 }
 0x13d   :  { %v548_v13 = vpop.permute.xlu1 %547 }
 0x141   :  { %v553_v19 = vpop.permute.xlu1 %552 }
 0x145   :  { %v558_v26 = vpop.permute.xlu1 %557 }
 0x1f0   :  { %v1155_v30 = vpop.f32.mrb[0].mxu1 }
 0x1f1   :  { %v417_v51 = vpop.f32.mrb[1].mxu1  ;;  %v562_v47 = vmul.f32 %v1155_v30, %v493_v54 }
 0x1f2   :  { %v560_v38 = vmul.f32 %v483_v52, %v417_v51  ;;  %v1156_v59 = vpop.f32.mrb[2].mxu1 }
 0x1f3   :  { %v420_v60 = vpop.f32.mrb[3].mxu1  ;;  %v563_v61 = vmul.f32 %v1156_v59, %v498_v56 }
 0x1f4   :  { %v561_v46 = vmul.f32 %v488_v53, %v420_v60  ;;  %1173 = vmatprep.mubr.msk.f32.mxu0 %vm585_vm0, %v560_v38 }
 0x1f6   :  { %1174 = vmatmul.mubr.msk.f32.vlgmr.msra.gmra.mrb[16].mxu0 %vm585_vm0, %v561_v46 }
 0x1f7   :  { %1176 = vmatprep.mubr.msk.f32.mxu0 %vm585_vm0, %v562_v47 }
 0x1f8   :  { %v1159_v62 = vpop.f32.mrb[4].mxu1 }
 0x1f9   :  { %v433_v0 = vpop.f32.mrb[5].mxu1  ;;  %v566_v6 = vmul.f32 %v1159_v62, %v513_v63 }
 0x1fa   :  { %v564_v1 = vmul.f32 %v503_v57, %v433_v0  ;;  %v1160_v2 = vpop.f32.mrb[6].mxu1  ;;  %1177 = vmatmul.mubr.msk.f32.gmra.mrb[18].mxu0 %vm585_vm0, %v563_v61 }
 0x1fb   :  { %v436_v3 = vpop.f32.mrb[7].mxu1  ;;  %v567_v8 = vmul.f32 %v1160_v2, %v518_v7 }
 0x1fc   :  { %v565_v4 = vmul.f32 %v508_v40, %v436_v3  ;;  %1179 = vmatprep.mubr.msk.f32.mxu0 %vm585_vm0, %v564_v1 }
 0x1fe   :  { %1180 = vmatmul.mubr.msk.f32.gmra.mrb[20].mxu0 %vm585_vm0, %v565_v4 }
 0x1ff   :  { %1182 = vmatprep.mubr.msk.f32.mxu0 %vm585_vm0, %v566_v6 }
 0x200   :  { %v1163_v9 = vpop.f32.mrb[8].mxu1 }
 0x201   :  { %v449_v10 = vpop.f32.mrb[9].mxu1  ;;  %v570_v16 = vmul.f32 %v1163_v9, %v533_v58 }
 0x202   :  { %v568_v11 = vmul.f32 %v523_v55, %v449_v10  ;;  %v1164_v12 = vpop.f32.mrb[10].mxu1  ;;  %1183 = vmatmul.mubr.msk.f32.gmra.mrb[22].mxu0 %vm585_vm0, %v567_v8 }
 0x203   :  { %v452_v14 = vpop.f32.mrb[11].mxu1  ;;  %v571_v17 = vmul.f32 %v1164_v12, %v538_v48 }
 0x204   :  { %v569_v15 = vmul.f32 %v528_v28, %v452_v14  ;;  %1185 = vmatprep.mubr.msk.f32.mxu1 %vm585_vm0, %v568_v11 }
 0x206   :  { %1186 = vmatmul.mubr.msk.f32.vlgmr.msra.gmra.mrb[16].mxu1 %vm585_vm0, %v569_v15 }
 0x207   :  { %1188 = vmatprep.mubr.msk.f32.mxu1 %vm585_vm0, %v570_v16 }
 0x208   :  { %v1167_v18 = vpop.f32.mrb[12].mxu1 }
 0x209   :  { %v465_v20 = vpop.f32.mrb[13].mxu1  ;;  %v574_v25 = vmul.f32 %v1167_v18, %v553_v19 }
 0x20a   :  { %v572_v21 = vmul.f32 %v543_v5, %v465_v20  ;;  %v1168_v22 = vpop.f32.mrb[14].mxu1  ;;  %1189 = vmatmul.mubr.msk.f32.gmra.mrb[18].mxu1 %vm585_vm0, %v571_v17 }
 0x20b   :  { %v468_v23 = vpop.f32.mrb[15].mxu1  ;;  %v575_v27 = vmul.f32 %v1168_v22, %v558_v26 }
 0x20c   :  { %v573_v24 = vmul.f32 %v548_v13, %v468_v23  ;;  %1191 = vmatprep.mubr.msk.f32.mxu1 %vm585_vm0, %v572_v21 }
 0x20e   :  { %1192 = vmatmul.mubr.msk.f32.gmra.mrb[20].mxu1 %vm585_vm0, %v573_v24 }
 0x20f   :  { %1194 = vmatprep.mubr.msk.f32.mxu1 %vm585_vm0, %v574_v25 }
 0x212   :  { %1195 = vmatmul.mubr.msk.f32.gmra.mrb[22].mxu1 %vm585_vm0, %v575_v27 }
 0x2c9   :  { %v1175_v33 = vpop.f32.mrb[16].mxu0 }
 0x2ca   :  { %v706_v34 = vadd.f32 %v1175_v33, %v1038_v32  ;;  %v700_v35 = vpop.f32.mrb[17].mxu0 }
 0x2cb   :  { %v701_v36 = vadd.f32 %v1038_v32, %v700_v35 }
 0x2cc   :  { %v783_v37 = vsel %vm781_vm1, %v706_v34, -inf }
 0x2cd   :  { %800 = vmax.xlane.f32.xlu1 %v783_v37  ;;  %v1178_v39 = vpop.f32.mrb[18].mxu0  ;;  %v782_v41 = vsel %vm781_vm1, %v701_v36, -inf }
 0x2ce   :  { %v716_v42 = vadd.f32 %v1178_v39, %v1038_v32  ;;  %798 = vmax.xlane.f32.xlu0 %v782_v41  ;;  %v710_v43 = vpop.f32.mrb[19].mxu0 }
 0x2cf   :  { %v711_v45 = vadd.f32 %v1038_v32, %v710_v43 }
 0x2d0   :  { %v785_v44 = vsel %vm781_vm1, %v716_v42, -inf }
 0x2d1   :  { %v1181_v49 = vpop.f32.mrb[20].mxu0  ;;  %v784_v55 = vsel %vm781_vm1, %v711_v45, -inf }
 0x2d2   :  { %804 = vmax.xlane.f32.xlu0 %v785_v44  ;;  %v720_v50 = vpop.f32.mrb[21].mxu0  ;;  %v726_v53 = vadd.f32 %v1181_v49, %v1038_v32 }
 0x2d3   :  { %v721_v52 = vadd.f32 %v1038_v32, %v720_v50 }
 0x2d4   :  { %v787_v51 = vsel %vm781_vm1, %v726_v53, -inf }
 0x2d5   :  { %v1184_v54 = vpop.f32.mrb[22].mxu0  ;;  %v786_v56 = vsel %vm781_vm1, %v721_v52, -inf }
 0x2d6   :  { %802 = vmax.xlane.f32.xlu0 %v784_v55  ;;  %806 = vmax.xlane.f32.xlu1 %v786_v56  ;;  %v730_v28 = vpop.f32.mrb[23].mxu0  ;;  %v736_v30 = vadd.f32 %v1184_v54, %v1038_v32 }
 0x2d7   :  { %v731_v57 = vadd.f32 %v1038_v32, %v730_v28 }
 0x2d8   :  { %v1551_v47 = vsel %vm781_vm1, %v736_v30, -inf }
 0x2d9   :  { %v1187_v58 = vpop.f32.mrb[16].mxu1  ;;  %v788_v38 = vsel %vm781_vm1, %v731_v57, -inf }
 0x2da   :  { %v740_v59 = vpop.f32.mrb[17].mxu1  ;;  %808 = vmax.xlane.f32.xlu0 %v787_v51  ;;  %810 = vmax.xlane.f32.xlu1 %v788_v38  ;;  %v746_v60 = vadd.f32 %v1187_v58, %v1038_v32 }
 0x2db   :  { %v741_v40 = vadd.f32 %v1038_v32, %v740_v59 }
 0x2dc   :  { %v1558_v1 = vsel %vm781_vm1, %v746_v60, -inf }
 0x2dd   :  { %v1190_v46 = vpop.f32.mrb[18].mxu1  ;;  %v790_v48 = vsel %vm781_vm1, %v741_v40, -inf }
 0x2de   :  { %v750_v61 = vpop.f32.mrb[19].mxu1  ;;  %812 = vmax.xlane.f32.xlu0 %v1551_v47  ;;  %814 = vmax.xlane.f32.xlu1 %v790_v48  ;;  %v756_v63 = vadd.f32 %v1190_v46, %v1038_v32 }
 0x2df   :  { %v751_v62 = vadd.f32 %v1038_v32, %v750_v61 }
 0x2e0   :  { %v1568_v7 = vsel %vm781_vm1, %v756_v63, -inf }
 0x2e1   :  { %v1193_v0 = vpop.f32.mrb[20].mxu1  ;;  %v1562_v2 = vsel %vm781_vm1, %v751_v62, -inf }
 0x2e2   :  { %v760_v3 = vpop.f32.mrb[21].mxu1  ;;  %816 = vmax.xlane.f32.xlu0 %v1558_v1  ;;  %818 = vmax.xlane.f32.xlu1 %v1562_v2  ;;  %v766_v5 = vadd.f32 %v1193_v0, %v1038_v32 }
 0x2e3   :  { %v761_v4 = vadd.f32 %v1038_v32, %v760_v3 }
 0x2e4   :  { %v1578_v12 = vsel %vm781_vm1, %v766_v5, -inf }
 0x2e5   :  { %v1196_v6 = vpop.f32.mrb[22].mxu1  ;;  %v1572_v8 = vsel %vm781_vm1, %v761_v4, -inf }
 0x2e6   :  { %v770_v9 = vpop.f32.mrb[23].mxu1  ;;  %820 = vmax.xlane.f32.xlu0 %v1568_v7  ;;  %822 = vmax.xlane.f32.xlu1 %v1572_v8  ;;  %v776_v11 = vadd.f32 %v1196_v6, %v1038_v32 }
 0x2e7   :  { %v771_v10 = vadd.f32 %v1038_v32, %v770_v9 }
 0x2e8   :  { %v1588_v14 = vsel %vm781_vm1, %v776_v11, -inf }
 0x2e9   :  { %v1582_v13 = vsel %vm781_vm1, %v771_v10, -inf }
 0x2ea   :  { %824 = vmax.xlane.f32.xlu0 %v1578_v12  ;;  %826 = vmax.xlane.f32.xlu1 %v1582_v13 }
 0x2ee   :  { %828 = vmax.xlane.f32.xlu0 %v1588_v14 }
 0x35a   :  { %v801_v15 = vpop.xlane.xlu1 %800 }
 0x35b   :  { %v1591_v16 = vsub.f32 %v783_v37, %v801_v15  ;;  %v799_v17 = vpop.xlane.xlu0 %798 }
 0x35c   :  { %v1593_v18 = vsub.f32 %v782_v41, %v799_v17 }
 0x35d   :  { %v848_v19 = vmul.f32 1.442695, %v1591_v16 }
 0x35e   :  { %v846_v20 = vmul.f32 1.442695, %v1593_v18 }
 0x35f   :  { %1225 = vpow2.f32 %v848_v19  ;;  %v805_v21 = vpop.xlane.xlu0 %804 }
 0x360   :  { %1227 = vpow2.f32 %v846_v20  ;;  %v1597_v22 = vsub.f32 %v785_v44, %v805_v21 }
 0x362   :  { %v852_v23 = vmul.f32 1.442695, %v1597_v22 }
 0x363   :  { %v807_v24 = vpop.xlane.xlu1 %806  ;;  %v803_v25 = vpop.xlane.xlu0 %802 }
 0x364   :  { %1229 = vpow2.f32 %v852_v23  ;;  %v1600_v26 = vsub.f32 %v786_v56, %v807_v24  ;;  %v1602_v27 = vsub.f32 %v784_v55, %v803_v25 }
 0x366   :  { %v850_v29 = vmul.f32 1.442695, %v1602_v27  ;;  %v854_v32 = vmul.f32 1.442695, %v1600_v26 }
 0x367   :  { %v811_v33 = vpop.xlane.xlu1 %810  ;;  %v809_v34 = vpop.xlane.xlu0 %808 }
 0x368   :  { %v1606_v35 = vsub.f32 %v788_v38, %v811_v33  ;;  %v1608_v36 = vsub.f32 %v787_v51, %v809_v34  ;;  %1231 = vpow2.f32 %v850_v29 }
 0x369   :  { %v1226_v37 = vpop.eup %1225  ;;  %1233 = vpow2.f32 %v854_v32 }
 0x36a   :  { %v1228_v39 = vpop.eup %1227  ;;  %v856_v41 = vmul.f32 1.442695, %v1608_v36  ;;  %v879_v42 = vsel %vm781_vm1, %v1226_v37, 0.0  ;;  %v858_v43 = vmul.f32 1.442695, %v1606_v35 }
 0x36b   :  { %896 = vadd.xlane.f32.xlu0 %v879_v42  ;;  %v815_v44 = vpop.xlane.xlu1 %814  ;;  %v813_v45 = vpop.xlane.xlu0 %812  ;;  %v878_v49 = vsel %vm781_vm1, %v1228_v39, 0.0 }
 0x36c   :  { %v1616_v50 = vsub.f32 %v790_v48, %v815_v44  ;;  %v1619_v52 = vsub.f32 %v1551_v47, %v813_v45  ;;  %894 = vadd.xlane.f32.xlu1 %v878_v49  ;;  %1235 = vpow2.f32 %v856_v41 }
 0x36d   :  { %1237 = vpow2.f32 %v858_v43 }
 0x36e   :  { %v1230_v53 = vpop.eup %1229  ;;  %v860_v54 = vmul.f32 1.442695, %v1619_v52  ;;  %v862_v55 = vmul.f32 1.442695, %v1616_v50 }
 0x36f   :  { %v819_v56 = vpop.xlane.xlu1 %818  ;;  %v817_v28 = vpop.xlane.xlu0 %816  ;;  %v881_v57 = vsel %vm781_vm1, %v1230_v53, 0.0 }
 0x370   :  { %v1626_v30 = vsub.f32 %v1562_v2, %v819_v56  ;;  %v1629_v58 = vsub.f32 %v1558_v1, %v817_v28  ;;  %900 = vadd.xlane.f32.xlu0 %v881_v57  ;;  %1239 = vpow2.f32 %v860_v54 }
 0x371   :  { %1241 = vpow2.f32 %v862_v55 }
 0x372   :  { %v864_v51 = vmul.f32 1.442695, %v1629_v58  ;;  %v1232_v38 = vpop.eup %1231  ;;  %v866_v59 = vmul.f32 1.442695, %v1626_v30 }
 0x373   :  { %v823_v40 = vpop.xlane.xlu1 %822  ;;  %v821_v60 = vpop.xlane.xlu0 %820  ;;  %v880_v48 = vsel %vm781_vm1, %v1232_v38, 0.0 }
 0x374   :  { %v1634_v46 = vsub.f32 %v1572_v8, %v823_v40  ;;  %v1637_v47 = vsub.f32 %v1568_v7, %v821_v60  ;;  %v1234_v61 = vpop.eup %1233  ;;  %1243 = vpow2.f32 %v864_v51  ;;  %898 = vadd.xlane.f32.xlu1 %v880_v48 }
 0x375   :  { %1245 = vpow2.f32 %v866_v59  ;;  %v882_v5 = vsel %vm781_vm1, %v1234_v61, 0.0 }
 0x376   :  { %v868_v62 = vmul.f32 1.442695, %v1637_v47  ;;  %v1236_v63 = vpop.eup %1235  ;;  %v870_v0 = vmul.f32 1.442695, %v1634_v46 }
 0x377   :  { %v827_v1 = vpop.xlane.xlu1 %826  ;;  %v825_v2 = vpop.xlane.xlu0 %824  ;;  %v883_v6 = vsel %vm781_vm1, %v1236_v63, 0.0 }
 0x378   :  { %v1644_v3 = vsub.f32 %v1582_v13, %v827_v1  ;;  %v1647_v4 = vsub.f32 %v1578_v12, %v825_v2  ;;  %v1238_v7 = vpop.eup %1237  ;;  %1247 = vpow2.f32 %v868_v62  ;;  %902 = vadd.xlane.f32.xlu1 %v882_v5  ;;  %904 = vadd.xlane.f32.xlu0 %v883_v6 }
 0x379   :  { %1249 = vpow2.f32 %v870_v0  ;;  %v884_v13 = vsel %vm781_vm1, %v1238_v7, 0.0 }
 0x37a   :  { %v872_v8 = vmul.f32 1.442695, %v1647_v4  ;;  %v1240_v9 = vpop.eup %1239  ;;  %v874_v10 = vmul.f32 1.442695, %v1644_v3 }
 0x37b   :  { %v829_v11 = vpop.xlane.xlu0 %828  ;;  %v885_v15 = vsel %vm781_vm1, %v1240_v9, 0.0  ;;  %v1242_v17 = vpop.eup %1241 }
 0x37c   :  { %v1656_v12 = vsub.f32 %v1588_v14, %v829_v11  ;;  %1251 = vpow2.f32 %v872_v8  ;;  %906 = vadd.xlane.f32.xlu1 %v884_v13  ;;  %908 = vadd.xlane.f32.xlu0 %v885_v15  ;;  %v886_v21 = vsel %vm781_vm1, %v1242_v17, 0.0 }
 0x37d   :  { %1253 = vpow2.f32 %v874_v10 }
 0x37e   :  { %v876_v19 = vmul.f32 1.442695, %v1656_v12  ;;  %v1244_v20 = vpop.eup %1243 }
 0x37f   :  { %v887_v14 = vsel %vm781_vm1, %v1244_v20, 0.0  ;;  %v1246_v23 = vpop.eup %1245 }
 0x380   :  { %1255 = vpow2.f32 %v876_v19  ;;  %910 = vadd.xlane.f32.xlu1 %v886_v21  ;;  %912 = vadd.xlane.f32.xlu0 %v887_v14  ;;  %v888_v25 = vsel %vm781_vm1, %v1246_v23, 0.0 }
 0x382   :  { %v1248_v24 = vpop.eup %1247 }
 0x383   :  { %v889_v29 = vsel %vm781_vm1, %v1248_v24, 0.0  ;;  %v1250_v32 = vpop.eup %1249 }
 0x384   :  { %914 = vadd.xlane.f32.xlu1 %v888_v25  ;;  %916 = vadd.xlane.f32.xlu0 %v889_v29  ;;  %v890_v34 = vsel %vm781_vm1, %v1250_v32, 0.0 }
 0x386   :  { %v1252_v33 = vpop.eup %1251 }
 0x387   :  { %v891_v37 = vsel %vm781_vm1, %v1252_v33, 0.0  ;;  %v1254_v39 = vpop.eup %1253 }
 0x388   :  { %918 = vadd.xlane.f32.xlu1 %v890_v34  ;;  %920 = vadd.xlane.f32.xlu0 %v891_v37  ;;  %v892_v43 = vsel %vm781_vm1, %v1254_v39, 0.0 }
 0x38a   :  { %v1256_v41 = vpop.eup %1255 }
 0x38b   :  { %v893_v42 = vsel %vm781_vm1, %v1256_v41, 0.0 }
 0x38c   :  { %922 = vadd.xlane.f32.xlu1 %v892_v43  ;;  %924 = vadd.xlane.f32.xlu0 %v893_v42 }
 0x3f8   :  { %v897_v44 = vpop.xlane.xlu0 %896 }
 0x3f9   :  { %1257 = vlog2.f32 %v897_v44  ;;  %v895_v45 = vpop.xlane.xlu1 %894 }
 0x3fa   :  { %1259 = vlog2.f32 %v895_v45 }
 0x3fd   :  { %v901_v49 = vpop.xlane.xlu0 %900 }
 0x3fe   :  { %1261 = vlog2.f32 %v901_v49 }
 0x401   :  { %v899_v53 = vpop.xlane.xlu1 %898 }
 0x402   :  { %1263 = vlog2.f32 %v899_v53 }
 0x403   :  { %v1258_v54 = vpop.eup %1257 }
 0x404   :  { %v1260_v55 = vpop.eup %1259  ;;  %v929_v56 = vmul.f32 0.6931472, %v1258_v54 }
 0x405   :  { %v927_v28 = vmul.f32 0.6931472, %v1260_v55  ;;  %v903_v51 = vpop.xlane.xlu1 %902  ;;  %v905_v38 = vpop.xlane.xlu0 %904 }
 0x406   :  { %v959_v57 = vsub.f32 %v1591_v16, %v929_v56  ;;  %1265 = vlog2.f32 %v903_v51 }
 0x407   :  { %v958_v59 = vsub.f32 %v1593_v18, %v927_v28  ;;  %1267 = vlog2.f32 %v905_v38 }
 0x408   :  { %v1262_v40 = vpop.eup %1261  ;;  %v975_v60 = vsel %vm781_vm1, %v959_v57, 0.0 }
 0x409   :  { %991 = vst [vmem:[#allocation2 + $0x8] sm:$0xff] %v975_v60  ;;  %v974_v48 = vsel %vm781_vm1, %v958_v59, 0.0  ;;  %v933_v61 = vmul.f32 0.6931472, %v1262_v40  ;;  %v907_v62 = vpop.xlane.xlu1 %906  ;;  %v909_v63 = vpop.xlane.xlu0 %908 }
 0x40a   :  { %990 = vst [vmem:[#allocation2] sm:$0xff] %v974_v48  ;;  %1269 = vlog2.f32 %v907_v62 }
 0x40b   :  { %v961_v16 = vsub.f32 %v1597_v22, %v933_v61  ;;  %1271 = vlog2.f32 %v909_v63 }
 0x40c   :  { %v1264_v0 = vpop.eup %1263 }
 0x40d   :  { %v977_v18 = vsel %vm781_vm1, %v961_v16, 0.0  ;;  %v931_v1 = vmul.f32 0.6931472, %v1264_v0  ;;  %v911_v2 = vpop.xlane.xlu1 %910  ;;  %v913_v5 = vpop.xlane.xlu0 %912 }
 0x40e   :  { %993 = vst [vmem:[#allocation2 + $0x18] sm:$0xff] %v977_v18  ;;  %1273 = vlog2.f32 %v911_v2 }
 0x40f   :  { %v960_v6 = vsub.f32 %v1602_v27, %v931_v1  ;;  %1275 = vlog2.f32 %v913_v5 }
 0x410   :  { %v1266_v7 = vpop.eup %1265 }
 0x411   :  { %v1268_v8 = vpop.eup %1267  ;;  %v976_v9 = vsel %vm781_vm1, %v960_v6, 0.0  ;;  %v935_v22 = vmul.f32 0.6931472, %v1266_v7  ;;  %v915_v10 = vpop.xlane.xlu1 %914 }
 0x412   :  { %v917_v11 = vpop.xlane.xlu0 %916  ;;  %992 = vst [vmem:[#allocation2 + $0x10] sm:$0xff] %v976_v9  ;;  %v937_v13 = vmul.f32 0.6931472, %v1268_v8  ;;  %1277 = vlog2.f32 %v915_v10 }
 0x413   :  { %v962_v15 = vsub.f32 %v1600_v26, %v935_v22  ;;  %1279 = vlog2.f32 %v917_v11 }
 0x414   :  { %v1270_v17 = vpop.eup %1269  ;;  %v963_v19 = vsub.f32 %v1608_v36, %v937_v13 }
 0x415   :  { %v1272_v20 = vpop.eup %1271  ;;  %v978_v27 = vsel %vm781_vm1, %v962_v15, 0.0  ;;  %v939_v21 = vmul.f32 0.6931472, %v1270_v17  ;;  %v919_v14 = vpop.xlane.xlu1 %918 }
 0x416   :  { %v921_v23 = vpop.xlane.xlu0 %920  ;;  %994 = vst [vmem:[#allocation2 + $0x20] sm:$0xff] %v978_v27  ;;  %v979_v24 = vsel %vm781_vm1, %v963_v19, 0.0  ;;  %v941_v25 = vmul.f32 0.6931472, %v1272_v20  ;;  %1281 = vlog2.f32 %v919_v14 }
 0x417   :  { %995 = vst [vmem:[#allocation2 + $0x28] sm:$0xff] %v979_v24  ;;  %v964_v26 = vsub.f32 %v1606_v35, %v939_v21  ;;  %1283 = vlog2.f32 %v921_v23 }
 0x418   :  { %v1274_v29 = vpop.eup %1273  ;;  %v965_v36 = vsub.f32 %v1619_v52, %v941_v25 }
 0x419   :  { %v1276_v32 = vpop.eup %1275  ;;  %v980_v33 = vsel %vm781_vm1, %v964_v26, 0.0  ;;  %v943_v34 = vmul.f32 0.6931472, %v1274_v29  ;;  %v923_v37 = vpop.xlane.xlu1 %922 }
 0x41a   :  { %v925_v39 = vpop.xlane.xlu0 %924  ;;  %996 = vst [vmem:[#allocation2 + $0x30] sm:$0xff] %v980_v33  ;;  %v981_v41 = vsel %vm781_vm1, %v965_v36, 0.0  ;;  %v945_v42 = vmul.f32 0.6931472, %v1276_v32  ;;  %1285 = vlog2.f32 %v923_v37 }
 0x41b   :  { %997 = vst [vmem:[#allocation2 + $0x38] sm:$0xff] %v981_v41  ;;  %v966_v35 = vsub.f32 %v1616_v50, %v943_v34  ;;  %1287 = vlog2.f32 %v925_v39 }
 0x41c   :  { %v1278_v43 = vpop.eup %1277  ;;  %v967_v52 = vsub.f32 %v1629_v58, %v945_v42 }
 0x41d   :  { %v1280_v44 = vpop.eup %1279  ;;  %v982_v45 = vsel %vm781_vm1, %v966_v35, 0.0  ;;  %v947_v49 = vmul.f32 0.6931472, %v1278_v43 }
 0x41e   :  { %998 = vst [vmem:[#allocation2 + $0x40] sm:$0xff] %v982_v45  ;;  %v983_v53 = vsel %vm781_vm1, %v967_v52, 0.0  ;;  %v949_v54 = vmul.f32 0.6931472, %v1280_v44 }
 0x41f   :  { %999 = vst [vmem:[#allocation2 + $0x48] sm:$0xff] %v983_v53  ;;  %v968_v55 = vsub.f32 %v1626_v30, %v947_v49 }
 0x420   :  { %v1282_v56 = vpop.eup %1281  ;;  %v969_v50 = vsub.f32 %v1637_v47, %v949_v54 }
 0x421   :  { %v1284_v28 = vpop.eup %1283  ;;  %v984_v58 = vsel %vm781_vm1, %v968_v55, 0.0  ;;  %v951_v57 = vmul.f32 0.6931472, %v1282_v56 }
 0x422   :  { %1000 = vst [vmem:[#allocation2 + $0x50] sm:$0xff] %v984_v58  ;;  %v985_v51 = vsel %vm781_vm1, %v969_v50, 0.0  ;;  %v953_v38 = vmul.f32 0.6931472, %v1284_v28 }
 0x423   :  { %1001 = vst [vmem:[#allocation2 + $0x58] sm:$0xff] %v985_v51  ;;  %v970_v59 = vsub.f32 %v1634_v46, %v951_v57 }
 0x424   :  { %v1286_v40 = vpop.eup %1285  ;;  %v971_v60 = vsub.f32 %v1647_v4, %v953_v38 }
 0x425   :  { %v1288_v30 = vpop.eup %1287  ;;  %v986_v47 = vsel %vm781_vm1, %v970_v59, 0.0  ;;  %v955_v48 = vmul.f32 0.6931472, %v1286_v40 }
 0x426   :  { %1002 = vst [vmem:[#allocation2 + $0x60] sm:$0xff] %v986_v47  ;;  %v987_v61 = vsel %vm781_vm1, %v971_v60, 0.0  ;;  %v957_v62 = vmul.f32 0.6931472, %v1288_v30 }
 0x427   :  { %1003 = vst [vmem:[#allocation2 + $0x68] sm:$0xff] %v987_v61  ;;  %v972_v63 = vsub.f32 %v1644_v3, %v955_v48 }
 0x428   :  { %v973_v46 = vsub.f32 %v1656_v12, %v957_v62 }
 0x429   :  { %v988_v4 = vsel %vm781_vm1, %v972_v63, 0.0 }
 0x42a   :  { %1004 = vst [vmem:[#allocation2 + $0x70] sm:$0xff] %v988_v4  ;;  %v989_v16 = vsel %vm781_vm1, %v973_v46, 0.0 }
 0x42b   :  { %1005 = vst [vmem:[#allocation2 + $0x78] sm:$0xff] %v989_v16 }
 0x42c   :  { %1300 = shalt.err (!%p1297_p4)
}
 0x42d   :  { %s1301_s12 = scalar_lea.hbm %s1744_s5, 2048 }
 0x42e   :  { %p1302_p5 = scmp.ne.s32.totalorder %s1744_s5, %s1301_s12  ;;  %p1305_p6 = scmp.lt.u32.totalorder %s1301_s12, %s1744_s5 }
 0x430   :  { %p1307_p7 = pnand %p1305_p6, %p1302_p5 }
 0x432   :  { %1310 = shalt.err (!%p1307_p7)
}
 0x433   :  { %s1315_s17 = smov 128   ;;  %s1316_s18 = smov 8  }
 0x434   :  { %1017 = dma.vmem_to_hbm [thread:$0]  %s1012_s8, 2048, %s1744_s5, [#allocation3], %s1315_s17, %s1315_s17, %s1316_s18  }
 0x435   :  { %1311 = dma.done.wait [#allocation3], 2048  }
 0x436   :  { %1312 = vsyncadd [#allocation3], 4294965248 }
 0x437   :  { %1021 = vsyncpa [#allocation3], 1 }

</bundles_post_ra>
